<compile_context>
chip_gen: v7x
topology: tpu7x:2x2x1
jax: 0.10.0
libtpu: 0.0.40
codegen_flags: <defaults>
</compile_context>

<pallas_src>
import functools

import jax
import jax.numpy as jnp
from jax.experimental import pallas as pl
from jax.experimental.pallas import tpu as pltpu


def _round_up(x, m):
    return ((x + m - 1) // m) * m


def _vmem_capacity_bytes():
    try:
        return int(pltpu.get_tpu_info().vmem_capacity_bytes)
    except Exception:
        return 64 * 1024 * 1024            # conservative default (v7x per-TC)


def _plan(n_pad, d_pad):
    """Pick tiles, the VMEM limit, and resident- vs streamed-X for this chip."""
    cap = _vmem_capacity_bytes()
    # ~100 MiB on 128 MiB chips (v5e/v6e), ~54 MiB on v7x's 64 MiB.
    vmem_limit = max(32 * 1024 * 1024, min(100 * 1024 * 1024, int(cap * 0.85)))
    budget = vmem_limit - 4 * 1024 * 1024  # headroom for Mosaic internal scratch

    def pick(cands, min_tiles=1):
        for c in cands:
            if n_pad % c == 0 and n_pad // c >= min_tiles:
                return c
        return 128

    # >=2 row tiles so the "parallel" axis can split across v7x's 2 TensorCores.
    tm = pick((512, 256, 128), min_tiles=2)
    tk = pick((2048, 1024, 512, 256, 128))

    def footprint(resident, tm_, tk_):
        if resident:
            # TODO(synk): pipeline_mode=pl.Buffered(1) on the X spec would make
            # this a single buffer; budget the default double-buffering for now.
            x_bytes = 2 * n_pad * d_pad * 2                     # bf16 resident
        else:
            x_bytes = 2 * tk_ * d_pad * 2                       # streamed blocks
        a_bytes = 2 * tm_ * tk_                                 # int8 A stream
        io_bytes = 2 * tm_ * d_pad * (4 + 4 + 2) + 2 * tm_ * 4  # sum_in+outs+dsc
        return x_bytes + a_bytes + io_bytes

    resident = footprint(True, tm, tk) <= budget
    if not resident:
        # v7x 64 MiB fallback: big row tile keeps X re-reads << A stream.
        tm = pick((1024, 512, 256, 128), min_tiles=2)
        while footprint(False, tm, tk) > budget and tk > 128:
            tk //= 2
    return dict(tm=tm, tk=tk, resident_x=resident, vmem_limit=vmem_limit)


# ----------------------------------------------------------------------------
# Kernel: one LightGCN propagation layer in factored form.
#   grid = (N_pad // TM, N_pad // TK)   (row tiles "parallel", K "arbitrary")
#   a_ref      (TM, TK)   int8  binary adjacency tile (streamed, 1 B/elem)
#   x_ref      (N_pad, D_pad) resident  OR  (TK, D_pad) streamed, bf16
#              X_l = D^-1/2 E_l
#   dsc_ref    (TM, 1)    f32   d_i^-1/2 for this row tile
#   sum_in_ref (TM, D_pad) f32  running sum  E_0 + ... + E_l
#   x_out_ref  (TM, D_pad) bf16 X_{l+1} = D^-1/2 E_{l+1}   (next layer's input)
#   sum_out_ref(TM, D_pad) f32  running sum + E_{l+1}      (aliased to sum_in)
# The A @ X_l accumulation happens directly in sum_out_ref (index_map constant
# over k => block resident across the reduction axis) -- no scratch needed.
# ----------------------------------------------------------------------------
def _propagate_layer_kernel(a_ref, x_ref, dsc_ref, sum_in_ref,
                            x_out_ref, sum_out_ref, *, tk, resident_x):
    k = pl.program_id(1)

    @pl.when(k == 0)
    def _():
        sum_out_ref[...] = jnp.zeros_like(sum_out_ref)

    a_tile = a_ref[...].astype(jnp.bfloat16)          # exact: values are {0, 1}
    if resident_x:
        off = pl.multiple_of(k * tk, tk)
        x_blk = x_ref[pl.ds(off, tk), :]              # K-slice of resident X_l
    else:
        x_blk = x_ref[...]                            # streamed (TK, D_pad) tile
    sum_out_ref[...] += jnp.dot(a_tile, x_blk,
                                preferred_element_type=jnp.float32)

    @pl.when(k == pl.num_programs(1) - 1)
    def _():
        dsc = dsc_ref[...]                            # (TM, 1)  d^-1/2
        raw = sum_out_ref[...]                        # A @ X_l  (f32)
        e_next = raw * dsc                            # = (G E_l) rows = E_{l+1}
        x_out_ref[...] = (e_next * dsc).astype(x_out_ref.dtype)   # X_{l+1}
        sum_out_ref[...] = sum_in_ref[...] + e_next   # fused layer-sum update


def _make_layer_call(n_pad, d_pad, tm, tk, resident_x, vmem_limit):
    kern = functools.partial(_propagate_layer_kernel, tk=tk,
                             resident_x=resident_x)
    if resident_x:
        x_spec = pl.BlockSpec((n_pad, d_pad), lambda i, k: (0, 0))
    else:
        x_spec = pl.BlockSpec((tk, d_pad), lambda i, k: (k, 0))
    return pl.pallas_call(
        kern,
        out_shape=(
            jax.ShapeDtypeStruct((n_pad, d_pad), jnp.bfloat16),   # X_{l+1}
            jax.ShapeDtypeStruct((n_pad, d_pad), jnp.float32),    # running sum
        ),
        grid_spec=pltpu.PrefetchScalarGridSpec(
            num_scalar_prefetch=0,
            grid=(n_pad // tm, n_pad // tk),
            in_specs=[
                pl.BlockSpec((tm, tk), lambda i, k: (i, k)),      # A int8 tile
                x_spec,                                           # X_l
                pl.BlockSpec((tm, 1), lambda i, k: (i, 0)),       # d^-1/2 rows
                pl.BlockSpec((tm, d_pad), lambda i, k: (i, 0)),   # running sum in
            ],
            out_specs=[
                pl.BlockSpec((tm, d_pad), lambda i, k: (i, 0)),   # X_{l+1}
                pl.BlockSpec((tm, d_pad), lambda i, k: (i, 0)),   # running sum out
            ],
        ),
        input_output_aliases={3: 1},      # running sum updated in place
        compiler_params=pltpu.CompilerParams(
            dimension_semantics=("parallel", "arbitrary"),
            vmem_limit_bytes=vmem_limit,
        ),
    )


# ----------------------------------------------------------------------------
# One-time preparation (hoisted out of the jitted forward)
# ----------------------------------------------------------------------------
def prepare_lightgcn_state(params):
    """Pad / cast the graph and embeddings once, outside the hot path.

    Exact reparameterization of G = D^-1/2 A D^-1/2: binary A stored as int8
    plus the per-node scale d^-1/2, instead of a bf16-rounded dense G.
    """
    # TODO(synk): real LightGCN adjacencies are <<1% dense; a block-sparse
    # kernel (scalar-prefetched per-row-tile nonzero K-block lists) would
    # replace this dense int8 stream.
    user_w = jnp.asarray(params["embedding_user"], jnp.float32)
    item_w = jnp.asarray(params["embedding_item"], jnp.float32)
    A = jnp.asarray(params["adjacency"], jnp.float32)          # binary {0, 1}
    num_users, D = user_w.shape
    N = A.shape[0]
    n_pad = _round_up(N, 128)
    d_pad = _round_up(D, 128)

    deg = A.sum(axis=1)
    d_inv_sqrt = jnp.where(deg > 0.0, 1.0 / jnp.sqrt(deg), 0.0)

    a_i8 = jnp.zeros((n_pad, n_pad), jnp.int8).at[:N, :N].set(A.astype(jnp.int8))
    dsc = jnp.zeros((n_pad, 1), jnp.float32).at[:N, 0].set(d_inv_sqrt)
    e0 = jnp.concatenate([user_w, item_w], axis=0)             # torch.cat
    e0_pad = jnp.zeros((n_pad, d_pad), jnp.float32).at[:N, :D].set(e0)
    x0 = (e0_pad * dsc).astype(jnp.bfloat16)                   # X_0 = D^-1/2 E_0

    arrays = dict(a_int8=a_i8, d_inv_sqrt=dsc, x0=x0, e0=e0_pad)
    meta = dict(n=N, d=D, num_users=num_users, n_pad=n_pad, d_pad=d_pad,
                **_plan(n_pad, d_pad))
    return arrays, meta


# ----------------------------------------------------------------------------
# Full LightGCN.forward(users, items)
# ----------------------------------------------------------------------------
def lightgcn_forward(state, users, items, *, meta, n_layers):
    layer = _make_layer_call(meta["n_pad"], meta["d_pad"], meta["tm"],
                             meta["tk"], meta["resident_x"], meta["vmem_limit"])
    x = state["x0"]                   # bf16  D^-1/2 E_0
    s = state["e0"]                   # f32   running sum, starts at exact E_0
    for _ in range(n_layers):
        x, s = layer(state["a_int8"], x, state["d_inv_sqrt"], s)
    mean_emb = s[:meta["n"], :meta["d"]] * jnp.float32(1.0 / (n_layers + 1))
    all_users = mean_emb[:meta["num_users"]]
    all_items = mean_emb[meta["num_users"]:]
    users_emb = all_users[users]                   # embedding gather (XLA glue)
    items_emb = all_items[items]
    # Per review: the mul + sum(dim=1) score is overhead-dominated as a
    # standalone pallas_call; keep it fused with the gather in plain XLA.
    return jnp.sum(users_emb * items_emb, axis=1)


# ----------------------------------------------------------------------------
# Pure-JAX f32 reference (mirrors the PyTorch module exactly) for validation
# ----------------------------------------------------------------------------
def reference_forward(params, users, items, n_layers):
    user_w = params["embedding_user"]
    item_w = params["embedding_item"]
    A = params["adjacency"]
    num_users = user_w.shape[0]
    deg = A.sum(axis=1)
    d_inv_sqrt = jnp.where(deg > 0, 1.0 / jnp.sqrt(deg), 0.0)
    G = A * d_inv_sqrt[:, None] * d_inv_sqrt[None, :]     # dataset.getSparseGraph()
    all_emb = jnp.concatenate([user_w, item_w], axis=0)
    embeds = [all_emb]
    cur = all_emb
    for _ in range(n_layers):
        cur = G @ cur
        embeds.append(cur)
    mean_emb = jnp.mean(jnp.stack(embeds, axis=1), axis=1)
    all_users = mean_emb[:num_users]
    all_items = mean_emb[num_users:]
    return jnp.sum(all_users[users] * all_items[items], axis=1)


def build_interaction_adjacency(key, num_users, num_items, density=0.15):
    # Dense binary stand-in for dataset.getSparseGraph()'s structure:
    #   A = [[0, R], [R^T, 0]];  G = D^-1/2 A D^-1/2 is formed densely in the
    #   reference and in factored int8 + d^-1/2 form for the kernel.
    R = (jax.random.uniform(key, (num_users, num_items)) < density).astype(jnp.float32)
    N = num_users + num_items
    A = jnp.zeros((N, N), jnp.float32)
    A = A.at[:num_users, num_users:].set(R)
    A = A.at[num_users:, :num_users].set(R.T)
    return A


if __name__ == "__main__":
    # Small synthetic config (consistent with the module's __init__)
    num_users = 48
    num_items = 80
    latent_dim = 64
    n_layers = 3
    batch = 16

    key = jax.random.PRNGKey(0)
    k_u, k_i, k_g, k_bu, k_bi = jax.random.split(key, 5)

    params = {
        # nn.init.normal_(weight, std=0.1)
        "embedding_user": 0.1 * jax.random.normal(k_u, (num_users, latent_dim), jnp.float32),
        "embedding_item": 0.1 * jax.random.normal(k_i, (num_items, latent_dim), jnp.float32),
        "adjacency": build_interaction_adjacency(k_g, num_users, num_items),
    }

    users = jax.random.randint(k_bu, (batch,), 0, num_users, dtype=jnp.int32)
    items = jax.random.randint(k_bi, (batch,), 0, num_items, dtype=jnp.int32)

    # One-time prep (padding / int8 cast / degree scales) -- out of the hot path.
    state, meta = prepare_lightgcn_state(params)

    fwd = jax.jit(functools.partial(lightgcn_forward, meta=meta, n_layers=n_layers))
    gamma = jax.block_until_ready(fwd(state, users, items))
    # Re-run to check the in-place (aliased) running-sum update does not
    # corrupt the prepared state across calls (jit inputs are not donated).
    gamma2 = jax.block_until_ready(fwd(state, users, items))

    gamma_ref = reference_forward(params, users, items, n_layers)
    assert gamma.shape == (batch,)
    assert jnp.allclose(gamma, gamma2), "prepared state corrupted across calls"
    # Tighter tolerance than the previous all-bf16-G version: the adjacency is
    # now exact (int8 {0,1} + factored d^-1/2); only X_l is rounded to bf16.
    assert jnp.allclose(gamma, gamma_ref, rtol=2e-2, atol=2e-3), (gamma, gamma_ref)

    print("KERNEL_OK")
</pallas_src>

<mosaic_0001>
module attributes {stable_mosaic.version = 11 : i64} {
  func.func @_propagate_layer_kernel(%arg0: i32, %arg1: i32, %arg2: memref<128x128xi8, #tpu.memory_space<vmem>>, %arg3: memref<128x128xbf16, #tpu.memory_space<vmem>>, %arg4: memref<128x1xf32, #tpu.memory_space<vmem>>, %arg5: memref<128x128xf32, #tpu.memory_space<vmem>>, %arg6: memref<128x128xbf16, #tpu.memory_space<vmem>>, %arg7: memref<128x128xf32, #tpu.memory_space<vmem>>) attributes {dimension_semantics = [#tpu.dimension_semantics<parallel>, #tpu.dimension_semantics<arbitrary>], iteration_bounds = array<i64: 1, 1>, scalar_prefetch = 0 : i64, scratch_operands = 0 : i64, tpu.core_type = #tpu.core_type<tc>, window_params = [{transform_indices = @transform_0, window_bounds = array<i64: 128, 128>}, {pipeline_mode = #tpu.pipeline_mode<synchronous>, transform_indices = @transform_1, window_bounds = array<i64: 128, 128>}, {transform_indices = @transform_2, window_bounds = array<i64: 128, 1>}, {transform_indices = @transform_3, window_bounds = array<i64: 128, 128>}, {transform_indices = @transform_4, window_bounds = array<i64: 128, 128>}, {transform_indices = @transform_5, window_bounds = array<i64: 128, 128>}]} {
    %c0_i32 = arith.constant 0 : i32
    %0 = arith.cmpi eq, %arg1, %c0_i32 : i32
    %1 = arith.extui %0 : i1 to i32
    %c0_i32_0 = arith.constant 0 : i32
    %2 = arith.cmpi ne, %1, %c0_i32_0 : i32
    scf.if %2 {
      %cst_9 = arith.constant 0.000000e+00 : f32
      %16 = vector.broadcast %cst_9 : f32 to vector<128x128xf32>
      %c0_10 = arith.constant 0 : index
      %c0_11 = arith.constant 0 : index
      %17 = vector.load %arg7[%c0_10, %c0_11] : memref<128x128xf32, #tpu.memory_space<vmem>>, vector<128x128xf32>
      tpu.vector_store %arg7[%c0_10, %c0_11], %16 {strides = array<i32>} : memref<128x128xf32, #tpu.memory_space<vmem>>, vector<128x128xf32>,
    } else {
    }
    %c0 = arith.constant 0 : index
    %c0_1 = arith.constant 0 : index
    %3 = vector.load %arg2[%c0, %c0_1] : memref<128x128xi8, #tpu.memory_space<vmem>>, vector<128x128xi8>
    %4 = arith.sitofp %3 : vector<128x128xi8> to vector<128x128xbf16>
    %c128_i32 = arith.constant 128 : i32
    %5 = arith.muli %arg1, %c128_i32 : i32
    %6 = tpu.assume_multiple %5, 128 : i32
    %7 = arith.index_cast %6 : i32 to index
    %c0_2 = arith.constant 0 : index
    %8 = vector.load %arg3[%7, %c0_2] : memref<128x128xbf16, #tpu.memory_space<vmem>>, vector<128x128xbf16>
    %c0_3 = arith.constant 0 : index
    %c0_4 = arith.constant 0 : index
    %9 = vector.load %arg7[%c0_3, %c0_4] : memref<128x128xf32, #tpu.memory_space<vmem>>, vector<128x128xf32>
    %cst = arith.constant dense<0.000000e+00> : vector<128x128xf32>
    %10 = tpu.matmul %4, %8, %cst {dimension_numbers = #tpu.dot_dimension_numbers<[1], [0], [0], [1], [0, 0, 1, 1], [], []>} : vector<128x128xbf16>, vector<128x128xbf16>, vector<128x128xf32> -> vector<128x128xf32>
    %11 = arith.addf %9, %10 : vector<128x128xf32>
    %c0_5 = arith.constant 0 : index
    %c0_6 = arith.constant 0 : index
    %12 = vector.load %arg7[%c0_5, %c0_6] : memref<128x128xf32, #tpu.memory_space<vmem>>, vector<128x128xf32>
    tpu.vector_store %arg7[%c0_5, %c0_6], %11 {strides = array<i32>} : memref<128x128xf32, #tpu.memory_space<vmem>>, vector<128x128xf32>,
    %c0_i32_7 = arith.constant 0 : i32
    %13 = arith.cmpi eq, %arg1, %c0_i32_7 : i32
    %14 = arith.extui %13 : i1 to i32
    %c0_i32_8 = arith.constant 0 : i32
    %15 = arith.cmpi ne, %14, %c0_i32_8 : i32
    scf.if %15 {
      %c0_9 = arith.constant 0 : index
      %c0_10 = arith.constant 0 : index
      %16 = vector.load %arg4[%c0_9, %c0_10] : memref<128x1xf32, #tpu.memory_space<vmem>>, vector<128x1xf32>
      %c0_11 = arith.constant 0 : index
      %c0_12 = arith.constant 0 : index
      %17 = vector.load %arg7[%c0_11, %c0_12] : memref<128x128xf32, #tpu.memory_space<vmem>>, vector<128x128xf32>
      %18 = vector.broadcast %16 : vector<128x1xf32> to vector<128x128xf32>
      %19 = arith.mulf %17, %18 : vector<128x128xf32>
      %20 = vector.broadcast %16 : vector<128x1xf32> to vector<128x128xf32>
      %21 = arith.mulf %19, %20 : vector<128x128xf32>
      %22 = arith.truncf %21 : vector<128x128xf32> to vector<128x128xbf16>
      %c0_13 = arith.constant 0 : index
      %c0_14 = arith.constant 0 : index
      %23 = vector.load %arg6[%c0_13, %c0_14] : memref<128x128xbf16, #tpu.memory_space<vmem>>, vector<128x128xbf16>
      tpu.vector_store %arg6[%c0_13, %c0_14], %22 {strides = array<i32>} : memref<128x128xbf16, #tpu.memory_space<vmem>>, vector<128x128xbf16>,
      %c0_15 = arith.constant 0 : index
      %c0_16 = arith.constant 0 : index
      %24 = vector.load %arg5[%c0_15, %c0_16] : memref<128x128xf32, #tpu.memory_space<vmem>>, vector<128x128xf32>
      %25 = arith.addf %24, %19 : vector<128x128xf32>
      %c0_17 = arith.constant 0 : index
      %c0_18 = arith.constant 0 : index
      %26 = vector.load %arg7[%c0_17, %c0_18] : memref<128x128xf32, #tpu.memory_space<vmem>>, vector<128x128xf32>
      tpu.vector_store %arg7[%c0_17, %c0_18], %25 {strides = array<i32>} : memref<128x128xf32, #tpu.memory_space<vmem>>, vector<128x128xf32>,
    } else {
    }
    return
  }
  func.func @transform_0(%arg0: i32, %arg1: i32) -> (i32, i32) {
    %c0_i32 = arith.constant 0 : i32
    return %arg0, %arg1 : i32, i32
  }
  func.func @transform_1(%arg0: i32, %arg1: i32) -> (i32, i32) {
    %c0_i32 = arith.constant 0 : i32
    %c0_i32_0 = arith.constant 0 : i32
    %c0_i32_1 = arith.constant 0 : i32
    return %c0_i32, %c0_i32_0 : i32, i32
  }
  func.func @transform_2(%arg0: i32, %arg1: i32) -> (i32, i32) {
    %c0_i32 = arith.constant 0 : i32
    %c0_i32_0 = arith.constant 0 : i32
    return %arg0, %c0_i32 : i32, i32
  }
  func.func @transform_3(%arg0: i32, %arg1: i32) -> (i32, i32) {
    %c0_i32 = arith.constant 0 : i32
    %c0_i32_0 = arith.constant 0 : i32
    return %arg0, %c0_i32 : i32, i32
  }
  func.func @transform_4(%arg0: i32, %arg1: i32) -> (i32, i32) {
    %c0_i32 = arith.constant 0 : i32
    %c0_i32_0 = arith.constant 0 : i32
    return %arg0, %c0_i32 : i32, i32
  }
  func.func @transform_5(%arg0: i32, %arg1: i32) -> (i32, i32) {
    %c0_i32 = arith.constant 0 : i32
    %c0_i32_0 = arith.constant 0 : i32
    return %arg0, %c0_i32 : i32, i32
  }
}

module attributes {stable_mosaic.version = 11 : i64} {
  func.func @_propagate_layer_kernel(%arg0: i32, %arg1: i32, %arg2: memref<128x128xi8, #tpu.memory_space<vmem>>, %arg3: memref<128x128xbf16, #tpu.memory_space<vmem>>, %arg4: memref<128x1xf32, #tpu.memory_space<vmem>>, %arg5: memref<128x128xf32, #tpu.memory_space<vmem>>, %arg6: memref<128x128xbf16, #tpu.memory_space<vmem>>, %arg7: memref<128x128xf32, #tpu.memory_space<vmem>>) attributes {dimension_semantics = [#tpu.dimension_semantics<parallel>, #tpu.dimension_semantics<arbitrary>], iteration_bounds = array<i64: 1, 1>, scalar_prefetch = 0 : i64, scratch_operands = 0 : i64, tpu.core_type = #tpu.core_type<tc>, window_params = [{transform_indices = @transform_0, window_bounds = array<i64: 128, 128>}, {pipeline_mode = #tpu.pipeline_mode<synchronous>, transform_indices = @transform_1, window_bounds = array<i64: 128, 128>}, {transform_indices = @transform_2, window_bounds = array<i64: 128, 1>}, {transform_indices = @transform_3, window_bounds = array<i64: 128, 128>}, {transform_indices = @transform_4, window_bounds = array<i64: 128, 128>}, {transform_indices = @transform_5, window_bounds = array<i64: 128, 128>}]} {
    %c0_i32 = arith.constant 0 : i32
    %0 = arith.cmpi eq, %arg1, %c0_i32 : i32
    %1 = arith.extui %0 : i1 to i32
    %c0_i32_0 = arith.constant 0 : i32
    %2 = arith.cmpi ne, %1, %c0_i32_0 : i32
    scf.if %2 {
      %cst_9 = arith.constant 0.000000e+00 : f32
      %16 = vector.broadcast %cst_9 : f32 to vector<128x128xf32>
      %c0_10 = arith.constant 0 : index
      %c0_11 = arith.constant 0 : index
      %17 = vector.load %arg7[%c0_10, %c0_11] : memref<128x128xf32, #tpu.memory_space<vmem>>, vector<128x128xf32>
      tpu.vector_store %arg7[%c0_10, %c0_11], %16 {strides = array<i32>} : memref<128x128xf32, #tpu.memory_space<vmem>>, vector<128x128xf32>,
    } else {
    }
    %c0 = arith.constant 0 : index
    %c0_1 = arith.constant 0 : index
    %3 = vector.load %arg2[%c0, %c0_1] : memref<128x128xi8, #tpu.memory_space<vmem>>, vector<128x128xi8>
    %4 = arith.sitofp %3 : vector<128x128xi8> to vector<128x128xbf16>
    %c128_i32 = arith.constant 128 : i32
    %5 = arith.muli %arg1, %c128_i32 : i32
    %6 = tpu.assume_multiple %5, 128 : i32
    %7 = arith.index_cast %6 : i32 to index
    %c0_2 = arith.constant 0 : index
    %8 = vector.load %arg3[%7, %c0_2] : memref<128x128xbf16, #tpu.memory_space<vmem>>, vector<128x128xbf16>
    %c0_3 = arith.constant 0 : index
    %c0_4 = arith.constant 0 : index
    %9 = vector.load %arg7[%c0_3, %c0_4] : memref<128x128xf32, #tpu.memory_space<vmem>>, vector<128x128xf32>
    %cst = arith.constant dense<0.000000e+00> : vector<128x128xf32>
    %10 = tpu.matmul %4, %8, %cst {dimension_numbers = #tpu.dot_dimension_numbers<[1], [0], [0], [1], [0, 0, 1, 1], [], []>} : vector<128x128xbf16>, vector<128x128xbf16>, vector<128x128xf32> -> vector<128x128xf32>
    %11 = arith.addf %9, %10 : vector<128x128xf32>
    %c0_5 = arith.constant 0 : index
    %c0_6 = arith.constant 0 : index
    %12 = vector.load %arg7[%c0_5, %c0_6] : memref<128x128xf32, #tpu.memory_space<vmem>>, vector<128x128xf32>
    tpu.vector_store %arg7[%c0_5, %c0_6], %11 {strides = array<i32>} : memref<128x128xf32, #tpu.memory_space<vmem>>, vector<128x128xf32>,
    %c0_i32_7 = arith.constant 0 : i32
    %13 = arith.cmpi eq, %arg1, %c0_i32_7 : i32
    %14 = arith.extui %13 : i1 to i32
    %c0_i32_8 = arith.constant 0 : i32
    %15 = arith.cmpi ne, %14, %c0_i32_8 : i32
    scf.if %15 {
      %c0_9 = arith.constant 0 : index
      %c0_10 = arith.constant 0 : index
      %16 = vector.load %arg4[%c0_9, %c0_10] : memref<128x1xf32, #tpu.memory_space<vmem>>, vector<128x1xf32>
      %c0_11 = arith.constant 0 : index
      %c0_12 = arith.constant 0 : index
      %17 = vector.load %arg7[%c0_11, %c0_12] : memref<128x128xf32, #tpu.memory_space<vmem>>, vector<128x128xf32>
      %18 = vector.broadcast %16 : vector<128x1xf32> to vector<128x128xf32>
      %19 = arith.mulf %17, %18 : vector<128x128xf32>
      %20 = vector.broadcast %16 : vector<128x1xf32> to vector<128x128xf32>
      %21 = arith.mulf %19, %20 : vector<128x128xf32>
      %22 = arith.truncf %21 : vector<128x128xf32> to vector<128x128xbf16>
      %c0_13 = arith.constant 0 : index
      %c0_14 = arith.constant 0 : index
      %23 = vector.load %arg6[%c0_13, %c0_14] : memref<128x128xbf16, #tpu.memory_space<vmem>>, vector<128x128xbf16>
      tpu.vector_store %arg6[%c0_13, %c0_14], %22 {strides = array<i32>} : memref<128x128xbf16, #tpu.memory_space<vmem>>, vector<128x128xbf16>,
      %c0_15 = arith.constant 0 : index
      %c0_16 = arith.constant 0 : index
      %24 = vector.load %arg5[%c0_15, %c0_16] : memref<128x128xf32, #tpu.memory_space<vmem>>, vector<128x128xf32>
      %25 = arith.addf %24, %19 : vector<128x128xf32>
      %c0_17 = arith.constant 0 : index
      %c0_18 = arith.constant 0 : index
      %26 = vector.load %arg7[%c0_17, %c0_18] : memref<128x128xf32, #tpu.memory_space<vmem>>, vector<128x128xf32>
      tpu.vector_store %arg7[%c0_17, %c0_18], %25 {strides = array<i32>} : memref<128x128xf32, #tpu.memory_space<vmem>>, vector<128x128xf32>,
    } else {
    }
    return
  }
  func.func @transform_0(%arg0: i32, %arg1: i32) -> (i32, i32) {
    %c0_i32 = arith.constant 0 : i32
    return %arg0, %arg1 : i32, i32
  }
  func.func @transform_1(%arg0: i32, %arg1: i32) -> (i32, i32) {
    %c0_i32 = arith.constant 0 : i32
    %c0_i32_0 = arith.constant 0 : i32
    %c0_i32_1 = arith.constant 0 : i32
    return %c0_i32, %c0_i32_0 : i32, i32
  }
  func.func @transform_2(%arg0: i32, %arg1: i32) -> (i32, i32) {
    %c0_i32 = arith.constant 0 : i32
    %c0_i32_0 = arith.constant 0 : i32
    return %arg0, %c0_i32 : i32, i32
  }
  func.func @transform_3(%arg0: i32, %arg1: i32) -> (i32, i32) {
    %c0_i32 = arith.constant 0 : i32
    %c0_i32_0 = arith.constant 0 : i32
    return %arg0, %c0_i32 : i32, i32
  }
  func.func @transform_4(%arg0: i32, %arg1: i32) -> (i32, i32) {
    %c0_i32 = arith.constant 0 : i32
    %c0_i32_0 = arith.constant 0 : i32
    return %arg0, %c0_i32 : i32, i32
  }
  func.func @transform_5(%arg0: i32, %arg1: i32) -> (i32, i32) {
    %c0_i32 = arith.constant 0 : i32
    %c0_i32_0 = arith.constant 0 : i32
    return %arg0, %c0_i32 : i32, i32
  }
}

</mosaic_0001>

<bundles_post_ra>
// kernel: lightgcn_forward.3
= control target key start
LH: loop header
LB: loop body
LE: loop exit
PB: predicated region body
PF: predicated region fallthrough
CT: control target
= control target key end

     0   :  { %v714_v1 = vmov 0   ;;  %s1029_s1 = inlined_call_operand.vmem [shape: bf16[128,128], index: 1, kind: input, shape index: {}]   ;;  %s1030_s0 = inlined_call_operand.vmem [shape: s8[128,128], index: 0, kind: input, shape index: {}]   ;;  %s1031_s2 = inlined_call_operand.vmem [shape: f32[128,1], index: 2, kind: input, shape index: {}]   ;;  %s1032_s5 = inlined_call_operand.vmem [shape: f32[128,128], index: 5, kind: output, shape index: {1}, may-alias: {3,5}]   ;;  %s1033_s3 = inlined_call_operand.vmem [shape: f32[128,128], index: 3, kind: input, shape index: {}, may-alias: {3,5}]   ;;  %s1034_s4 = inlined_call_operand.vmem [shape: bf16[128,128], index: 4, kind: output, shape index: {0}]  }
   0x1   :  { %v706_v0 = vld [vmem:[%s1029_s1] sm:$0xff]   ;;  %705 = vset.pattern.permute.xlu1 %v714_v1  ;;  %704 = vset.pattern.permute.xlu0 %v714_v1  ;;  %v707_v2 = vld [vmem:[%s1029_s1 + $0x8] sm:$0xff]   ;;  %v708_v3 = vld [vmem:[%s1029_s1 + $0x10] sm:$0xff]  }
   0x2   :  { %654 = vmatprep.subr.bf16.mxu0 %v706_v0  ;;  %686 = vmatprep.subr.bf16.mxu1 %v706_v0  ;;  %v709_v4 = vld [vmem:[%s1029_s1 + $0x18] sm:$0xff]   ;;  %v760_v5 = vld [vmem:[%s1030_s0] sm:$0xff]  ;;  %v765_v6 = vld [vmem:[%s1030_s0 + $0x10] sm:$0xff] }
   0x3   :  { %655 = vmatpush3.bf16.msra.mxu0 %v706_v0  ;;  %694 = vmatpush3.bf16.msra.mxu1 %v706_v0  ;;  %v44_v7 = vunpack.c.l.s8.bf16 %v760_v5  ;;  %v48_v8 = vunpack.c.l.s8.bf16 %v765_v6  ;;  %v271_v9 = vld [vmem:[%s1031_s2 + $0x10] sm:$0xff]  ;;  %v269_v10 = vld [vmem:[%s1031_s2] sm:$0xff]  ;;  %v272_v11 = vld [vmem:[%s1031_s2 + $0x18] sm:$0xff]  ;;  %v45_v27 = vunpack.c.h.s8.bf16 %v760_v5  ;;  %v49_v28 = vunpack.c.h.s8.bf16 %v765_v6 }
   0x4   :  { %656 = vmatprep.subr.bf16.mxu0 %v707_v2  ;;  %687 = vmatprep.subr.bf16.mxu1 %v707_v2  ;;  %v270_v12 = vld [vmem:[%s1031_s2 + $0x8] sm:$0xff]  ;;  %v710_v13 = vld [vmem:[%s1029_s1 + $0x20] sm:$0xff]   ;;  %v276_v17 = vld [vmem:[%s1031_s2 + $0x38] sm:$0xff] }
   0x5   :  { %313 = vperm.xlu1 %705, %v271_v9   ;;  %303 = vperm.xlu0 %704, %v269_v10   ;;  %v274_v14 = vld [vmem:[%s1031_s2 + $0x28] sm:$0xff]  ;;  %v273_v15 = vld [vmem:[%s1031_s2 + $0x20] sm:$0xff]  ;;  %v275_v18 = vld [vmem:[%s1031_s2 + $0x30] sm:$0xff] }
   0x6   :  { %670 = vmatprep.mubr.bf16.mxu0 %v44_v7  ;;  %678 = vmatprep.mubr.bf16.mxu1 %v48_v8  ;;  %v711_v16 = vld [vmem:[%s1029_s1 + $0x28] sm:$0xff]   ;;  %v712_v19 = vld [vmem:[%s1029_s1 + $0x30] sm:$0xff]   ;;  %v277_v21 = vld [vmem:[%s1031_s2 + $0x40] sm:$0xff] }
   0x7   :  { %657 = vmatpush3.bf16.msra.mxu0 %v707_v2  ;;  %695 = vmatpush3.bf16.msra.mxu1 %v707_v2  ;;  %v278_v20 = vld [vmem:[%s1031_s2 + $0x48] sm:$0xff]  ;;  %v713_v22 = vld [vmem:[%s1029_s1 + $0x38] sm:$0xff]   ;;  %v279_v24 = vld [vmem:[%s1031_s2 + $0x50] sm:$0xff] }
   0x8   :  { %658 = vmatprep.subr.bf16.mxu0 %v708_v3  ;;  %688 = vmatprep.subr.bf16.mxu1 %v708_v3  ;;  %v280_v23 = vld [vmem:[%s1031_s2 + $0x58] sm:$0xff]  ;;  %v41_v25 = vld [vmem:[%s1030_s0 + $0x8] sm:$0xff]  ;;  %v281_v32 = vld [vmem:[%s1031_s2 + $0x60] sm:$0xff] }
   0x9   :  { %318 = vperm.xlu1 %705, %v272_v11   ;;  %308 = vperm.xlu0 %704, %v270_v12   ;;  %v43_v26 = vld [vmem:[%s1030_s0 + $0x18] sm:$0xff]  ;;  %v46_v29 = vunpack.c.l.s8.bf16 %v41_v25  ;;  %v282_v31 = vld [vmem:[%s1031_s2 + $0x68] sm:$0xff]  ;;  %v283_v34 = vld [vmem:[%s1031_s2 + $0x70] sm:$0xff]  ;;  %v47_v35 = vunpack.c.h.s8.bf16 %v41_v25 }
   0xa   :  { %v50_v30 = vunpack.c.l.s8.bf16 %v43_v26  ;;  %v284_v33 = vld [vmem:[%s1031_s2 + $0x78] sm:$0xff]  ;;  %v51_v36 = vunpack.c.h.s8.bf16 %v43_v26 }
   0xb   :  { %659 = vmatpush3.bf16.msra.mxu0 %v708_v3  ;;  %696 = vmatpush3.bf16.msra.mxu1 %v708_v3 }
   0xc   :  { %660 = vmatprep.subr.bf16.mxu0 %v709_v4  ;;  %689 = vmatprep.subr.bf16.mxu1 %v709_v4 }
   0xd   :  { %328 = vperm.xlu1 %705, %v274_v14   ;;  %323 = vperm.xlu0 %704, %v273_v15  }
   0xf   :  { %661 = vmatpush3.bf16.msra.mxu0 %v709_v4  ;;  %697 = vmatpush3.bf16.msra.mxu1 %v709_v4 }
  0x10   :  { %662 = vmatprep.subr.bf16.mxu0 %v710_v13  ;;  %690 = vmatprep.subr.bf16.mxu1 %v710_v13 }
  0x11   :  { %338 = vperm.xlu1 %705, %v276_v17   ;;  %333 = vperm.xlu0 %704, %v275_v18  }
  0x13   :  { %663 = vmatpush3.bf16.msra.mxu0 %v710_v13  ;;  %698 = vmatpush3.bf16.msra.mxu1 %v710_v13 }
  0x14   :  { %664 = vmatprep.subr.bf16.mxu0 %v711_v16  ;;  %691 = vmatprep.subr.bf16.mxu1 %v711_v16 }
  0x15   :  { %348 = vperm.xlu1 %705, %v278_v20   ;;  %343 = vperm.xlu0 %704, %v277_v21  }
  0x17   :  { %665 = vmatpush3.bf16.msra.mxu0 %v711_v16  ;;  %699 = vmatpush3.bf16.msra.mxu1 %v711_v16 }
  0x18   :  { %666 = vmatprep.subr.bf16.mxu0 %v712_v19  ;;  %692 = vmatprep.subr.bf16.mxu1 %v712_v19 }
  0x19   :  { %358 = vperm.xlu1 %705, %v280_v23   ;;  %353 = vperm.xlu0 %704, %v279_v24  }
  0x1b   :  { %667 = vmatpush3.bf16.msra.mxu0 %v712_v19  ;;  %700 = vmatpush3.bf16.msra.mxu1 %v712_v19 }
  0x1c   :  { %668 = vmatprep.subr.bf16.mxu0 %v713_v22  ;;  %693 = vmatprep.subr.bf16.mxu1 %v713_v22 }
  0x1d   :  { %368 = vperm.xlu1 %705, %v282_v31   ;;  %363 = vperm.xlu0 %704, %v281_v32  }
  0x1f   :  { %669 = vmatpush3.bf16.msra.mxu0 %v713_v22  ;;  %701 = vmatpush3.bf16.msra.mxu1 %v713_v22 }
  0x21   :  { %378 = vperm.xlu1 %705, %v284_v33   ;;  %373 = vperm.xlu0 %704, %v283_v34  }
  0x22   :  { %671 = vmatmul.mubr.bf16.vlgmr.msra.gmra.mrb[0].mxu0 %v45_v27  ;;  %679 = vmatmul.mubr.bf16.vlgmr.msra.gmra.mrb[0].mxu1 %v49_v28 }
  0x23   :  { %674 = vmatprep.mubr.bf16.mxu0 %v46_v29  ;;  %682 = vmatprep.mubr.bf16.mxu1 %v50_v30 }
  0x2a   :  { %675 = vmatmul.mubr.bf16.gmra.mrb[4].mxu0 %v47_v35  ;;  %683 = vmatmul.mubr.bf16.gmra.mrb[4].mxu1 %v51_v36 }
  0x84   :  { %v314_v37 = vpop.permute.xlu1 %313  ;;  %v304_v38 = vpop.permute.xlu0 %303 }
  0x88   :  { %v319_v39 = vpop.permute.xlu1 %318  ;;  %v309_v40 = vpop.permute.xlu0 %308 }
  0x8c   :  { %v837_v41 = vpop.permute.xlu1 %328  ;;  %v839_v42 = vpop.permute.xlu0 %323 }
  0x90   :  { %v841_v43 = vpop.permute.xlu1 %338  ;;  %v843_v44 = vpop.permute.xlu0 %333 }
  0x94   :  { %v349_v45 = vpop.permute.xlu1 %348  ;;  %v344_v46 = vpop.permute.xlu0 %343 }
  0x98   :  { %v359_v47 = vpop.permute.xlu1 %358  ;;  %v354_v48 = vpop.permute.xlu0 %353 }
  0x9c   :  { %v863_v63 = vpop.permute.xlu0 %363  ;;  %v871_v2 = vpop.permute.xlu1 %368 }
  0xa0   :  { %v374_v29 = vpop.permute.xlu0 %373 }
  0xf5   :  { %v672_v49 = vpop.f32.mrb[0].mxu0  ;;  %v680_v50 = vpop.f32.mrb[0].mxu1 }
  0xf6   :  { %v171_v51 = vpop.f32.mrb[1].mxu0  ;;  %v203_v52 = vpop.f32.mrb[1].mxu1  ;;  %252 = vst [vmem:[%s1032_s5 + $0x10] sm:$0xff] %v672_v49  ;;  %v383_v55 = vmul.f32 %v672_v49, %v314_v37  ;;  %260 = vst [vmem:[%s1032_s5 + $0x50] sm:$0xff] %v680_v50  ;;  %v391_v56 = vmul.f32 %v680_v50, %v354_v48 }
  0xf7   :  { %v673_v53 = vpop.f32.mrb[2].mxu0  ;;  %v681_v54 = vpop.f32.mrb[2].mxu1  ;;  %250 = vst [vmem:[%s1032_s5] sm:$0xff] %v171_v51  ;;  %v381_v59 = vmul.f32 %v304_v38, %v171_v51  ;;  %258 = vst [vmem:[%s1032_s5 + $0x40] sm:$0xff] %v203_v52  ;;  %v389_v60 = vmul.f32 %v344_v46, %v203_v52 }
  0xf8   :  { %v174_v57 = vpop.f32.mrb[3].mxu0  ;;  %v206_v58 = vpop.f32.mrb[3].mxu1  ;;  %253 = vst [vmem:[%s1032_s5 + $0x18] sm:$0xff] %v673_v53  ;;  %v384_v61 = vmul.f32 %v673_v53, %v319_v39  ;;  %261 = vst [vmem:[%s1032_s5 + $0x58] sm:$0xff] %v681_v54  ;;  %v392_v62 = vmul.f32 %v681_v54, %v359_v47  ;;  %v399_v3 = vmul.f32 %v383_v55, %v314_v37 }
  0xf9   :  { %251 = vst [vmem:[%s1032_s5 + $0x8] sm:$0xff] %v174_v57  ;;  %v382_v0 = vmul.f32 %v309_v40, %v174_v57  ;;  %259 = vst [vmem:[%s1032_s5 + $0x48] sm:$0xff] %v206_v58  ;;  %v390_v1 = vmul.f32 %v349_v45, %v206_v58  ;;  %v407_v4 = vmul.f32 %v391_v56, %v354_v48  ;;  %v379_v48 = vpop.permute.xlu1 %378 }
  0xfa   :  { %v400_v5 = vmul.f32 %v384_v61, %v319_v39  ;;  %v408_v6 = vmul.f32 %v392_v62, %v359_v47  ;;  %v397_v7 = vmul.f32 %v381_v59, %v304_v38  ;;  %v405_v8 = vmul.f32 %v389_v60, %v344_v46 }
  0xfb   :  { %v398_v9 = vmul.f32 %v382_v0, %v309_v40  ;;  %v406_v10 = vmul.f32 %v390_v1, %v349_v45 }
  0xfc   :  { %v599_v13 = vpack.c.bf16 %v400_v5, %v399_v3  ;;  %v619_v14 = vpack.c.bf16 %v408_v6, %v407_v4 }
  0xfd   :  { %v676_v11 = vpop.f32.mrb[4].mxu0  ;;  %v684_v12 = vpop.f32.mrb[4].mxu1  ;;  %v594_v19 = vpack.c.bf16 %v398_v9, %v397_v7  ;;  %v614_v20 = vpack.c.bf16 %v406_v10, %v405_v8 }
  0xfe   :  { %v187_v15 = vpop.f32.mrb[5].mxu0  ;;  %v219_v16 = vpop.f32.mrb[5].mxu1  ;;  %631 = vst [vmem:[%s1034_s4 + $0x8] sm:$0xff] %v599_v13   ;;  %635 = vst [vmem:[%s1034_s4 + $0x28] sm:$0xff] %v619_v14   ;;  %v387_v38 = vmul.f32 %v676_v11, %v843_v44  ;;  %v395_v39 = vmul.f32 %v684_v12, %v374_v29 }
  0xff   :  { %v677_v21 = vpop.f32.mrb[6].mxu0  ;;  %v685_v22 = vpop.f32.mrb[6].mxu1  ;;  %595 = vst [vmem:[%s1034_s4] sm:$0xff] %v594_v19   ;;  %634 = vst [vmem:[%s1034_s4 + $0x20] sm:$0xff] %v614_v20   ;;  %v385_v46 = vmul.f32 %v839_v42, %v187_v15  ;;  %v393_v47 = vmul.f32 %v863_v63, %v219_v16 }
 0x100   :  { %v495_v17 = vld [vmem:[%s1033_s3 + $0x10] sm:$0xff]  ;;  %v493_v25 = vld [vmem:[%s1033_s3] sm:$0xff]  ;;  %v190_v27 = vpop.f32.mrb[7].mxu0  ;;  %v222_v28 = vpop.f32.mrb[7].mxu1  ;;  %v388_v49 = vmul.f32 %v677_v21, %v841_v43  ;;  %v396_v50 = vmul.f32 %v685_v22, %v379_v48  ;;  %v403_v53 = vmul.f32 %v387_v38, %v843_v44 }
 0x101   :  { %v503_v18 = vld [vmem:[%s1033_s3 + $0x50] sm:$0xff]  ;;  %v511_v23 = vadd.f32 %v495_v17, %v383_v55  ;;  %v501_v26 = vld [vmem:[%s1033_s3 + $0x40] sm:$0xff]  ;;  %v509_v30 = vadd.f32 %v493_v25, %v381_v59  ;;  %v386_v51 = vmul.f32 %v837_v41, %v190_v27  ;;  %v394_v52 = vmul.f32 %v871_v2, %v222_v28 }
 0x102   :  { %v519_v24 = vadd.f32 %v503_v18, %v391_v56  ;;  %256 = vst [vmem:[%s1032_s5 + $0x30] sm:$0xff] %v676_v11  ;;  %264 = vst [vmem:[%s1032_s5 + $0x70] sm:$0xff] %v684_v12  ;;  %v517_v31 = vadd.f32 %v501_v26, %v389_v60  ;;  %v411_v55 = vmul.f32 %v395_v39, %v374_v29 }
 0x103   :  { %v401_v57 = vmul.f32 %v385_v46, %v839_v42  ;;  %v409_v58 = vmul.f32 %v393_v47, %v863_v63  ;;  %v402_v4 = vmul.f32 %v386_v51, %v837_v41  ;;  %v410_v42 = vmul.f32 %v394_v52, %v871_v2 }
 0x105   :  { %v604_v41 = vpack.c.bf16 %v402_v4, %v401_v57 }
 0x107   :  { %632 = vst [vmem:[%s1034_s4 + $0x10] sm:$0xff] %v604_v41  }
 0x109   :  { %v496_v32 = vld [vmem:[%s1033_s3 + $0x18] sm:$0xff] }
 0x10a   :  { %v504_v33 = vld [vmem:[%s1033_s3 + $0x58] sm:$0xff]  ;;  %v512_v34 = vadd.f32 %v496_v32, %v384_v61 }
 0x10b   :  { %254 = vst [vmem:[%s1032_s5 + $0x20] sm:$0xff] %v187_v15  ;;  %262 = vst [vmem:[%s1032_s5 + $0x60] sm:$0xff] %v219_v16  ;;  %v520_v35 = vadd.f32 %v504_v33, %v392_v62  ;;  %v404_v62 = vmul.f32 %v388_v49, %v841_v43  ;;  %v624_v43 = vpack.c.bf16 %v410_v42, %v409_v58 }
 0x10c   :  { %527 = vst [vmem:[%s1032_s5 + $0x10] sm:$0xff] %v511_v23  ;;  %535 = vst [vmem:[%s1032_s5 + $0x50] sm:$0xff] %v519_v24 }
 0x10d   :  { %v609_v63 = vpack.c.bf16 %v404_v62, %v403_v53  ;;  %636 = vst [vmem:[%s1034_s4 + $0x30] sm:$0xff] %v624_v43  }
 0x10f   :  { %633 = vst [vmem:[%s1034_s4 + $0x18] sm:$0xff] %v609_v63  }
 0x113   :  { %v494_v36 = vld [vmem:[%s1033_s3 + $0x8] sm:$0xff] }
 0x114   :  { %v502_v37 = vld [vmem:[%s1033_s3 + $0x48] sm:$0xff]  ;;  %v510_v40 = vadd.f32 %v494_v36, %v382_v0  ;;  %v412_v0 = vmul.f32 %v396_v50, %v379_v48 }
 0x115   :  { %525 = vst [vmem:[%s1032_s5] sm:$0xff] %v509_v30  ;;  %533 = vst [vmem:[%s1032_s5 + $0x40] sm:$0xff] %v517_v31  ;;  %v518_v45 = vadd.f32 %v502_v37, %v390_v1 }
 0x116   :  { %528 = vst [vmem:[%s1032_s5 + $0x18] sm:$0xff] %v512_v34  ;;  %536 = vst [vmem:[%s1032_s5 + $0x58] sm:$0xff] %v520_v35  ;;  %v629_v5 = vpack.c.bf16 %v412_v0, %v411_v55 }
 0x117   :  { %526 = vst [vmem:[%s1032_s5 + $0x8] sm:$0xff] %v510_v40  ;;  %534 = vst [vmem:[%s1032_s5 + $0x48] sm:$0xff] %v518_v45 }
 0x118   :  { %257 = vst [vmem:[%s1032_s5 + $0x38] sm:$0xff] %v677_v21  ;;  %265 = vst [vmem:[%s1032_s5 + $0x78] sm:$0xff] %v685_v22 }
 0x119   :  { %255 = vst [vmem:[%s1032_s5 + $0x28] sm:$0xff] %v190_v27  ;;  %263 = vst [vmem:[%s1032_s5 + $0x68] sm:$0xff] %v222_v28 }
 0x11a   :  { %637 = vst [vmem:[%s1034_s4 + $0x38] sm:$0xff] %v629_v5  }
 0x120   :  { %v499_v54 = vld [vmem:[%s1033_s3 + $0x30] sm:$0xff]  ;;  %v497_v61 = vld [vmem:[%s1033_s3 + $0x20] sm:$0xff] }
 0x121   :  { %v507_v56 = vld [vmem:[%s1033_s3 + $0x70] sm:$0xff]  ;;  %v515_v59 = vadd.f32 %v499_v54, %v387_v38  ;;  %v505_v44 = vld [vmem:[%s1033_s3 + $0x60] sm:$0xff]  ;;  %v513_v1 = vadd.f32 %v497_v61, %v385_v46 }
 0x122   :  { %v523_v60 = vadd.f32 %v507_v56, %v395_v39  ;;  %v521_v3 = vadd.f32 %v505_v44, %v393_v47 }
 0x123   :  { %531 = vst [vmem:[%s1032_s5 + $0x30] sm:$0xff] %v515_v59  ;;  %529 = vst [vmem:[%s1032_s5 + $0x20] sm:$0xff] %v513_v1 }
 0x124   :  { %539 = vst [vmem:[%s1032_s5 + $0x70] sm:$0xff] %v523_v60  ;;  %537 = vst [vmem:[%s1032_s5 + $0x60] sm:$0xff] %v521_v3 }
 0x12b   :  { %v500_v2 = vld [vmem:[%s1033_s3 + $0x38] sm:$0xff]  ;;  %v498_v7 = vld [vmem:[%s1033_s3 + $0x28] sm:$0xff] }
 0x12c   :  { %v508_v6 = vld [vmem:[%s1033_s3 + $0x78] sm:$0xff]  ;;  %v516_v8 = vadd.f32 %v500_v2, %v388_v49  ;;  %v514_v10 = vadd.f32 %v498_v7, %v386_v51  ;;  %v506_v11 = vld [vmem:[%s1033_s3 + $0x68] sm:$0xff] }
 0x12d   :  { %v524_v9 = vadd.f32 %v508_v6, %v396_v50  ;;  %v522_v12 = vadd.f32 %v506_v11, %v394_v52 }
 0x12e   :  { %532 = vst [vmem:[%s1032_s5 + $0x38] sm:$0xff] %v516_v8  ;;  %530 = vst [vmem:[%s1032_s5 + $0x28] sm:$0xff] %v514_v10 }
 0x12f   :  { %540 = vst [vmem:[%s1032_s5 + $0x78] sm:$0xff] %v524_v9  ;;  %538 = vst [vmem:[%s1032_s5 + $0x68] sm:$0xff] %v522_v12 }

// kernel: lightgcn_forward.5
= control target key start
LH: loop header
LB: loop body
LE: loop exit
PB: predicated region body
PF: predicated region fallthrough
CT: control target
= control target key end

     0   :  { %v754_v2 = vmov 0   ;;  %s1067_s0 = inlined_call_operand.vmem [shape: s8[128,128], index: 0, kind: input, shape index: {}]   ;;  %s1068_s1 = inlined_call_operand.vmem [shape: bf16[128,128], index: 1, kind: input, shape index: {}]   ;;  %s1069_s2 = inlined_call_operand.vmem [shape: f32[128,1], index: 2, kind: input, shape index: {}]   ;;  %s1070_s3 = inlined_call_operand.vmem [shape: f32[128,128], index: 3, kind: input, shape index: {}, may-alias: {3,5}]   ;;  %s1071_s4 = inlined_call_operand.hbm [shape: bf16[128,128], index: 4, kind: output, shape index: {0}]   ;;  %s1072_s5 = inlined_call_operand.vmem [shape: f32[128,128], index: 5, kind: output, shape index: {1}, may-alias: {3,5}]  }
   0x1   :  { %v722_v0 = vld [vmem:[%s1068_s1] sm:$0xff]   ;;  %v723_v1 = vld [vmem:[%s1068_s1 + $0x8] sm:$0xff]   ;;  %721 = vset.pattern.permute.xlu1 %v754_v2  ;;  %720 = vset.pattern.permute.xlu0 %v754_v2  ;;  %v724_v3 = vld [vmem:[%s1068_s1 + $0x10] sm:$0xff]  }
   0x2   :  { %667 = vmatprep.subr.bf16.mxu0 %v722_v0  ;;  %699 = vmatprep.subr.bf16.mxu1 %v722_v0  ;;  %v725_v4 = vld [vmem:[%s1068_s1 + $0x18] sm:$0xff]   ;;  %v803_v5 = vld [vmem:[%s1067_s0] sm:$0xff]  ;;  %v808_v6 = vld [vmem:[%s1067_s0 + $0x10] sm:$0xff] }
   0x3   :  { %668 = vmatpush3.bf16.msra.mxu0 %v722_v0  ;;  %707 = vmatpush3.bf16.msra.mxu1 %v722_v0  ;;  %v45_v7 = vunpack.c.l.s8.bf16 %v803_v5  ;;  %v49_v8 = vunpack.c.l.s8.bf16 %v808_v6  ;;  %v272_v9 = vld [vmem:[%s1069_s2 + $0x10] sm:$0xff]  ;;  %v270_v10 = vld [vmem:[%s1069_s2] sm:$0xff]  ;;  %v273_v11 = vld [vmem:[%s1069_s2 + $0x18] sm:$0xff] }
   0x4   :  { %669 = vmatprep.subr.bf16.mxu0 %v723_v1  ;;  %700 = vmatprep.subr.bf16.mxu1 %v723_v1  ;;  %v271_v12 = vld [vmem:[%s1069_s2 + $0x8] sm:$0xff]  ;;  %v726_v13 = vld [vmem:[%s1068_s1 + $0x20] sm:$0xff]  }
   0x5   :  { %314 = vperm.xlu1 %721, %v272_v9   ;;  %304 = vperm.xlu0 %720, %v270_v10  }
   0x6   :  { %683 = vmatprep.mubr.bf16.mxu0 %v45_v7  ;;  %691 = vmatprep.mubr.bf16.mxu1 %v49_v8 }
   0x7   :  { %670 = vmatpush3.bf16.msra.mxu0 %v723_v1  ;;  %708 = vmatpush3.bf16.msra.mxu1 %v723_v1 }
   0x8   :  { %671 = vmatprep.subr.bf16.mxu0 %v724_v3  ;;  %701 = vmatprep.subr.bf16.mxu1 %v724_v3 }
   0x9   :  { %319 = vperm.xlu1 %721, %v273_v11   ;;  %309 = vperm.xlu0 %720, %v271_v12  }
   0xb   :  { %672 = vmatpush3.bf16.msra.mxu0 %v724_v3  ;;  %709 = vmatpush3.bf16.msra.mxu1 %v724_v3 }
   0xc   :  { %673 = vmatprep.subr.bf16.mxu0 %v725_v4  ;;  %702 = vmatprep.subr.bf16.mxu1 %v725_v4 }
   0xd   :  { %11 = vsyncpa [#allocation3], 0  ;;  %v275_v14 = vld [vmem:[%s1069_s2 + $0x28] sm:$0xff]  ;;  %v274_v15 = vld [vmem:[%s1069_s2 + $0x20] sm:$0xff]  ;;  %v46_v27 = vunpack.c.h.s8.bf16 %v803_v5  ;;  %v50_v28 = vunpack.c.h.s8.bf16 %v808_v6  ;;  %s755_s12 = smov [#allocation2]  }
   0xe   :  { %v727_v16 = vld [vmem:[%s1068_s1 + $0x28] sm:$0xff]   ;;  %329 = vperm.xlu1 %721, %v275_v14   ;;  %324 = vperm.xlu0 %720, %v274_v15   ;;  %v277_v17 = vld [vmem:[%s1069_s2 + $0x38] sm:$0xff]  ;;  %v276_v18 = vld [vmem:[%s1069_s2 + $0x30] sm:$0xff]  ;;  %s547_s13 = sshll.u32 %s755_s12, 4  ;;  %s1024_s13 = int_to_ptr.vmem [resolvable:$true] %s547_s13 }
   0xf   :  { %674 = vmatpush3.bf16.msra.mxu0 %v725_v4  ;;  %710 = vmatpush3.bf16.msra.mxu1 %v725_v4  ;;  %v728_v19 = vld [vmem:[%s1068_s1 + $0x30] sm:$0xff]   ;;  %v279_v20 = vld [vmem:[%s1069_s2 + $0x48] sm:$0xff]  ;;  %v278_v21 = vld [vmem:[%s1069_s2 + $0x40] sm:$0xff]  ;;  %s730_s27 = scalar_lea.vmem %s1024_s13, 1024  ;;  %p735_p1 = scmp.lt.s32.totalorder %s1024_s13, %s1024_s13 }
  0x10   :  { %675 = vmatprep.subr.bf16.mxu0 %v726_v13  ;;  %703 = vmatprep.subr.bf16.mxu1 %v726_v13  ;;  %v729_v22 = vld [vmem:[%s1068_s1 + $0x38] sm:$0xff]   ;;  %v280_v24 = vld [vmem:[%s1069_s2 + $0x50] sm:$0xff]  ;;  %v42_v25 = vld [vmem:[%s1067_s0 + $0x8] sm:$0xff]  ;;  %p731_p0 = scmp.ne.s32.totalorder %s1024_s13, %s730_s27  ;;  %p736_p2 = scmp.lt.s32.totalorder %s730_s27, %s730_s27 }
  0x11   :  { %v281_v23 = vld [vmem:[%s1069_s2 + $0x58] sm:$0xff]  ;;  %v47_v29 = vunpack.c.l.s8.bf16 %v42_v25  ;;  %v283_v31 = vld [vmem:[%s1069_s2 + $0x68] sm:$0xff]  ;;  %v282_v32 = vld [vmem:[%s1069_s2 + $0x60] sm:$0xff]  ;;  %v48_v35 = vunpack.c.h.s8.bf16 %v42_v25 }
  0x12   :  { %339 = vperm.xlu1 %721, %v277_v17   ;;  %334 = vperm.xlu0 %720, %v276_v18   ;;  %v44_v26 = vld [vmem:[%s1067_s0 + $0x18] sm:$0xff]  ;;  %v284_v34 = vld [vmem:[%s1069_s2 + $0x70] sm:$0xff]  ;;  %p737_p3 = por %p736_p2, %p735_p1 }
  0x13   :  { %676 = vmatpush3.bf16.msra.mxu0 %v726_v13  ;;  %711 = vmatpush3.bf16.msra.mxu1 %v726_v13  ;;  %v51_v30 = vunpack.c.l.s8.bf16 %v44_v26  ;;  %v285_v33 = vld [vmem:[%s1069_s2 + $0x78] sm:$0xff]  ;;  %v52_v36 = vunpack.c.h.s8.bf16 %v44_v26 }
  0x14   :  { %677 = vmatprep.subr.bf16.mxu0 %v727_v16  ;;  %704 = vmatprep.subr.bf16.mxu1 %v727_v16  ;;  %p738_p4 = pnand %p737_p3, %p731_p0 }
  0x16   :  { %349 = vperm.xlu1 %721, %v279_v20   ;;  %344 = vperm.xlu0 %720, %v278_v21  }
  0x17   :  { %678 = vmatpush3.bf16.msra.mxu0 %v727_v16  ;;  %712 = vmatpush3.bf16.msra.mxu1 %v727_v16 }
  0x18   :  { %679 = vmatprep.subr.bf16.mxu0 %v728_v19  ;;  %705 = vmatprep.subr.bf16.mxu1 %v728_v19 }
  0x1a   :  { %359 = vperm.xlu1 %721, %v281_v23   ;;  %354 = vperm.xlu0 %720, %v280_v24  }
  0x1b   :  { %680 = vmatpush3.bf16.msra.mxu0 %v728_v19  ;;  %713 = vmatpush3.bf16.msra.mxu1 %v728_v19 }
  0x1c   :  { %681 = vmatprep.subr.bf16.mxu0 %v729_v22  ;;  %706 = vmatprep.subr.bf16.mxu1 %v729_v22 }
  0x1e   :  { %369 = vperm.xlu1 %721, %v283_v31   ;;  %364 = vperm.xlu0 %720, %v282_v32  }
  0x1f   :  { %682 = vmatpush3.bf16.msra.mxu0 %v729_v22  ;;  %714 = vmatpush3.bf16.msra.mxu1 %v729_v22 }
  0x22   :  { %684 = vmatmul.mubr.bf16.vlgmr.msra.gmra.mrb[0].mxu0 %v46_v27  ;;  %692 = vmatmul.mubr.bf16.vlgmr.msra.gmra.mrb[0].mxu1 %v50_v28 }
  0x23   :  { %687 = vmatprep.mubr.bf16.mxu0 %v47_v29  ;;  %695 = vmatprep.mubr.bf16.mxu1 %v51_v30 }
  0x24   :  { %379 = vperm.xlu1 %721, %v285_v33   ;;  %374 = vperm.xlu0 %720, %v284_v34  }
  0x2a   :  { %688 = vmatmul.mubr.bf16.gmra.mrb[4].mxu0 %v48_v35  ;;  %696 = vmatmul.mubr.bf16.gmra.mrb[4].mxu1 %v52_v36 }
  0x84   :  { %v315_v37 = vpop.permute.xlu1 %314  ;;  %v305_v38 = vpop.permute.xlu0 %304 }
  0x88   :  { %v320_v39 = vpop.permute.xlu1 %319  ;;  %v310_v40 = vpop.permute.xlu0 %309 }
  0x8d   :  { %v880_v41 = vpop.permute.xlu1 %329  ;;  %v882_v42 = vpop.permute.xlu0 %324 }
  0x91   :  { %v884_v43 = vpop.permute.xlu1 %339  ;;  %v886_v44 = vpop.permute.xlu0 %334 }
  0x95   :  { %v350_v45 = vpop.permute.xlu1 %349  ;;  %v345_v46 = vpop.permute.xlu0 %344 }
  0x99   :  { %v360_v47 = vpop.permute.xlu1 %359  ;;  %v355_v48 = vpop.permute.xlu0 %354 }
  0x9d   :  { %v906_v63 = vpop.permute.xlu0 %364  ;;  %v914_v2 = vpop.permute.xlu1 %369 }
  0xa3   :  { %v375_v29 = vpop.permute.xlu0 %374 }
  0xf5   :  { %v685_v49 = vpop.f32.mrb[0].mxu0  ;;  %v693_v50 = vpop.f32.mrb[0].mxu1 }
  0xf6   :  { %v172_v51 = vpop.f32.mrb[1].mxu0  ;;  %v204_v52 = vpop.f32.mrb[1].mxu1  ;;  %253 = vst [vmem:[%s1072_s5 + $0x10] sm:$0xff] %v685_v49  ;;  %v384_v55 = vmul.f32 %v685_v49, %v315_v37  ;;  %261 = vst [vmem:[%s1072_s5 + $0x50] sm:$0xff] %v693_v50  ;;  %v392_v56 = vmul.f32 %v693_v50, %v355_v48 }
  0xf7   :  { %v686_v53 = vpop.f32.mrb[2].mxu0  ;;  %v694_v54 = vpop.f32.mrb[2].mxu1  ;;  %251 = vst [vmem:[%s1072_s5] sm:$0xff] %v172_v51  ;;  %v382_v59 = vmul.f32 %v305_v38, %v172_v51  ;;  %259 = vst [vmem:[%s1072_s5 + $0x40] sm:$0xff] %v204_v52  ;;  %v390_v60 = vmul.f32 %v345_v46, %v204_v52 }
  0xf8   :  { %v175_v57 = vpop.f32.mrb[3].mxu0  ;;  %v207_v58 = vpop.f32.mrb[3].mxu1  ;;  %254 = vst [vmem:[%s1072_s5 + $0x18] sm:$0xff] %v686_v53  ;;  %v385_v61 = vmul.f32 %v686_v53, %v320_v39  ;;  %262 = vst [vmem:[%s1072_s5 + $0x58] sm:$0xff] %v694_v54  ;;  %v393_v62 = vmul.f32 %v694_v54, %v360_v47  ;;  %v400_v3 = vmul.f32 %v384_v55, %v315_v37 }
  0xf9   :  { %252 = vst [vmem:[%s1072_s5 + $0x8] sm:$0xff] %v175_v57  ;;  %v383_v0 = vmul.f32 %v310_v40, %v175_v57  ;;  %260 = vst [vmem:[%s1072_s5 + $0x48] sm:$0xff] %v207_v58  ;;  %v391_v1 = vmul.f32 %v350_v45, %v207_v58  ;;  %v408_v4 = vmul.f32 %v392_v56, %v355_v48  ;;  %v380_v48 = vpop.permute.xlu1 %379 }
  0xfa   :  { %v401_v5 = vmul.f32 %v385_v61, %v320_v39  ;;  %v409_v6 = vmul.f32 %v393_v62, %v360_v47  ;;  %v398_v7 = vmul.f32 %v382_v59, %v305_v38  ;;  %v406_v8 = vmul.f32 %v390_v60, %v345_v46 }
  0xfb   :  { %v399_v9 = vmul.f32 %v383_v0, %v310_v40  ;;  %v407_v10 = vmul.f32 %v391_v1, %v350_v45 }
  0xfc   :  { %v612_v13 = vpack.c.bf16 %v401_v5, %v400_v3  ;;  %v632_v14 = vpack.c.bf16 %v409_v6, %v408_v4 }
  0xfd   :  { %v689_v11 = vpop.f32.mrb[4].mxu0  ;;  %v697_v12 = vpop.f32.mrb[4].mxu1  ;;  %v607_v19 = vpack.c.bf16 %v399_v9, %v398_v7  ;;  %v627_v20 = vpack.c.bf16 %v407_v10, %v406_v8 }
  0xfe   :  { %v188_v15 = vpop.f32.mrb[5].mxu0  ;;  %v220_v16 = vpop.f32.mrb[5].mxu1  ;;  %644 = vst [vmem:[#allocation2 + $0x8] sm:$0xff] %v612_v13   ;;  %648 = vst [vmem:[#allocation2 + $0x28] sm:$0xff] %v632_v14   ;;  %v388_v38 = vmul.f32 %v689_v11, %v886_v44  ;;  %v396_v39 = vmul.f32 %v697_v12, %v375_v29 }
  0xff   :  { %v690_v21 = vpop.f32.mrb[6].mxu0  ;;  %v698_v22 = vpop.f32.mrb[6].mxu1  ;;  %608 = vst [vmem:[#allocation2] sm:$0xff] %v607_v19   ;;  %647 = vst [vmem:[#allocation2 + $0x20] sm:$0xff] %v627_v20   ;;  %v386_v46 = vmul.f32 %v882_v42, %v188_v15  ;;  %v394_v47 = vmul.f32 %v906_v63, %v220_v16 }
 0x100   :  { %v496_v17 = vld [vmem:[%s1070_s3 + $0x10] sm:$0xff]  ;;  %v494_v25 = vld [vmem:[%s1070_s3] sm:$0xff]  ;;  %v191_v27 = vpop.f32.mrb[7].mxu0  ;;  %v223_v28 = vpop.f32.mrb[7].mxu1  ;;  %v389_v49 = vmul.f32 %v690_v21, %v884_v43  ;;  %v397_v50 = vmul.f32 %v698_v22, %v380_v48  ;;  %v404_v53 = vmul.f32 %v388_v38, %v886_v44 }
 0x101   :  { %v504_v18 = vld [vmem:[%s1070_s3 + $0x50] sm:$0xff]  ;;  %v512_v23 = vadd.f32 %v496_v17, %v384_v55  ;;  %v502_v26 = vld [vmem:[%s1070_s3 + $0x40] sm:$0xff]  ;;  %v510_v30 = vadd.f32 %v494_v25, %v382_v59  ;;  %v387_v51 = vmul.f32 %v880_v41, %v191_v27  ;;  %v395_v52 = vmul.f32 %v914_v2, %v223_v28 }
 0x102   :  { %v520_v24 = vadd.f32 %v504_v18, %v392_v56  ;;  %257 = vst [vmem:[%s1072_s5 + $0x30] sm:$0xff] %v689_v11  ;;  %265 = vst [vmem:[%s1072_s5 + $0x70] sm:$0xff] %v697_v12  ;;  %v518_v31 = vadd.f32 %v502_v26, %v390_v60  ;;  %v412_v55 = vmul.f32 %v396_v39, %v375_v29 }
 0x103   :  { %v402_v57 = vmul.f32 %v386_v46, %v882_v42  ;;  %v410_v58 = vmul.f32 %v394_v47, %v906_v63  ;;  %v403_v42 = vmul.f32 %v387_v51, %v880_v41  ;;  %v411_v63 = vmul.f32 %v395_v52, %v914_v2 }
 0x105   :  { %v617_v41 = vpack.c.bf16 %v403_v42, %v402_v57 }
 0x107   :  { %645 = vst [vmem:[#allocation2 + $0x10] sm:$0xff] %v617_v41  }
 0x109   :  { %v497_v32 = vld [vmem:[%s1070_s3 + $0x18] sm:$0xff] }
 0x10a   :  { %v505_v33 = vld [vmem:[%s1070_s3 + $0x58] sm:$0xff]  ;;  %v513_v34 = vadd.f32 %v497_v32, %v385_v61 }
 0x10b   :  { %255 = vst [vmem:[%s1072_s5 + $0x20] sm:$0xff] %v188_v15  ;;  %263 = vst [vmem:[%s1072_s5 + $0x60] sm:$0xff] %v220_v16  ;;  %v521_v35 = vadd.f32 %v505_v33, %v393_v62  ;;  %v405_v62 = vmul.f32 %v389_v49, %v884_v43  ;;  %v637_v43 = vpack.c.bf16 %v411_v63, %v410_v58 }
 0x10c   :  { %528 = vst [vmem:[%s1072_s5 + $0x10] sm:$0xff] %v512_v23  ;;  %536 = vst [vmem:[%s1072_s5 + $0x50] sm:$0xff] %v520_v24 }
 0x10d   :  { %v622_v4 = vpack.c.bf16 %v405_v62, %v404_v53  ;;  %649 = vst [vmem:[#allocation2 + $0x30] sm:$0xff] %v637_v43  }
 0x10f   :  { %646 = vst [vmem:[#allocation2 + $0x18] sm:$0xff] %v622_v4  }
 0x113   :  { %v495_v36 = vld [vmem:[%s1070_s3 + $0x8] sm:$0xff] }
 0x114   :  { %v503_v37 = vld [vmem:[%s1070_s3 + $0x48] sm:$0xff]  ;;  %v511_v40 = vadd.f32 %v495_v36, %v383_v0  ;;  %v413_v0 = vmul.f32 %v397_v50, %v380_v48 }
 0x115   :  { %526 = vst [vmem:[%s1072_s5] sm:$0xff] %v510_v30  ;;  %534 = vst [vmem:[%s1072_s5 + $0x40] sm:$0xff] %v518_v31  ;;  %v519_v45 = vadd.f32 %v503_v37, %v391_v1 }
 0x116   :  { %529 = vst [vmem:[%s1072_s5 + $0x18] sm:$0xff] %v513_v34  ;;  %537 = vst [vmem:[%s1072_s5 + $0x58] sm:$0xff] %v521_v35  ;;  %v642_v5 = vpack.c.bf16 %v413_v0, %v412_v55 }
 0x117   :  { %527 = vst [vmem:[%s1072_s5 + $0x8] sm:$0xff] %v511_v40  ;;  %535 = vst [vmem:[%s1072_s5 + $0x48] sm:$0xff] %v519_v45 }
 0x118   :  { %258 = vst [vmem:[%s1072_s5 + $0x38] sm:$0xff] %v690_v21  ;;  %266 = vst [vmem:[%s1072_s5 + $0x78] sm:$0xff] %v698_v22 }
 0x119   :  { %256 = vst [vmem:[%s1072_s5 + $0x28] sm:$0xff] %v191_v27  ;;  %264 = vst [vmem:[%s1072_s5 + $0x68] sm:$0xff] %v223_v28 }
 0x11a   :  { %650 = vst [vmem:[#allocation2 + $0x38] sm:$0xff] %v642_v5  }
 0x120   :  { %v500_v54 = vld [vmem:[%s1070_s3 + $0x30] sm:$0xff]  ;;  %v498_v61 = vld [vmem:[%s1070_s3 + $0x20] sm:$0xff] }
 0x121   :  { %v508_v56 = vld [vmem:[%s1070_s3 + $0x70] sm:$0xff]  ;;  %v516_v59 = vadd.f32 %v500_v54, %v388_v38  ;;  %v506_v44 = vld [vmem:[%s1070_s3 + $0x60] sm:$0xff]  ;;  %v514_v1 = vadd.f32 %v498_v61, %v386_v46 }
 0x122   :  { %v524_v60 = vadd.f32 %v508_v56, %v396_v39  ;;  %v522_v3 = vadd.f32 %v506_v44, %v394_v47 }
 0x123   :  { %532 = vst [vmem:[%s1072_s5 + $0x30] sm:$0xff] %v516_v59  ;;  %530 = vst [vmem:[%s1072_s5 + $0x20] sm:$0xff] %v514_v1 }
 0x124   :  { %540 = vst [vmem:[%s1072_s5 + $0x70] sm:$0xff] %v524_v60  ;;  %538 = vst [vmem:[%s1072_s5 + $0x60] sm:$0xff] %v522_v3 }
 0x12b   :  { %v501_v2 = vld [vmem:[%s1070_s3 + $0x38] sm:$0xff]  ;;  %v499_v7 = vld [vmem:[%s1070_s3 + $0x28] sm:$0xff] }
 0x12c   :  { %v509_v6 = vld [vmem:[%s1070_s3 + $0x78] sm:$0xff]  ;;  %v517_v8 = vadd.f32 %v501_v2, %v389_v49  ;;  %v515_v10 = vadd.f32 %v499_v7, %v387_v51  ;;  %v507_v11 = vld [vmem:[%s1070_s3 + $0x68] sm:$0xff] }
 0x12d   :  { %v525_v9 = vadd.f32 %v509_v6, %v397_v50  ;;  %v523_v12 = vadd.f32 %v507_v11, %v395_v52 }
 0x12e   :  { %741 = shalt.err (!%p738_p4)
}
 0x12f   :  { %s742_s30 = scalar_lea.hbm %s1071_s4, 1024 }
 0x130   :  { %p743_p5 = scmp.ne.s32.totalorder %s1071_s4, %s742_s30  ;;  %p746_p6 = scmp.lt.u32.totalorder %s742_s30, %s1071_s4 }
 0x132   :  { %p748_p7 = pnand %p746_p6, %p743_p5 }
 0x134   :  { %751 = shalt.err (!%p748_p7)
}
 0x135   :  { %s756_s3 = smov 64   ;;  %s757_s10 = smov 4   ;;  %533 = vst [vmem:[%s1072_s5 + $0x38] sm:$0xff] %v517_v8  ;;  %541 = vst [vmem:[%s1072_s5 + $0x78] sm:$0xff] %v525_v9 }
 0x136   :  { %553 = dma.vmem_to_hbm [thread:$0]  %s1024_s13, 1024, %s1071_s4, [#allocation3], %s756_s3, %s756_s3, %s757_s10  }
 0x137   :  { %531 = vst [vmem:[%s1072_s5 + $0x28] sm:$0xff] %v515_v10  ;;  %539 = vst [vmem:[%s1072_s5 + $0x68] sm:$0xff] %v523_v12 }
 0x138   :  { %752 = dma.done.wait [#allocation3], 1024  }
 0x139   :  { %753 = vsyncadd [#allocation3], 4294966272 }
 0x13a   :  { %561 = vsyncpa [#allocation3], 1 }

</bundles_post_ra>
